<compile_context>
chip_gen: v6e
topology: v6e:2x2x1
jax: 0.10.0
libtpu: 0.0.40
codegen_flags: <defaults>
</compile_context>

<pallas_src>
import functools

import jax
import jax.numpy as jnp
from jax.experimental import pallas as pl
from jax.experimental.pallas import tpu as pltpu


def _round_up(n, m):
    return ((n + m - 1) // m) * m


def _linear_clamp_kernel(x_ref, w_ref, b_ref, o_ref, *, min_value, max_value):
    # Single MXU dot per tile: (TILE_M, 6) @ (6, 8) -> (TILE_M, 8), f32 accumulate.
    acc = jnp.dot(x_ref[...], w_ref[...], preferred_element_type=jnp.float32)
    acc = acc + b_ref[...]
    # clamp_min then clamp_max (matches torch semantics, incl. min > max case).
    acc = jnp.minimum(jnp.maximum(acc, min_value), max_value)
    o_ref[...] = acc.astype(o_ref.dtype)


def model_forward(x1, x2, weight, bias, *, min_value, max_value,
                  force_pallas=False):
    """x1: (B, 3), x2: (B, 3), weight: (8, 6), bias: (8,) -> (B, 8)."""
    # Wrapper-side layout plumbing (cheap fused XLA ops): one concatenated
    # input and a pre-transposed weight -> no in-kernel concat or transpose.
    x = jnp.concatenate([x1, x2], axis=1)                    # (B, 6)
    batch, in_features = x.shape
    out_features = weight.shape[0]
    w_t = jnp.transpose(weight)                              # (6, 8)
    bias2d = bias.reshape(1, out_features)                   # (1, 8)

    # Small-batch fast path: fixed custom-call / pipeline cost exceeds the
    # whole computation for tiny B; XLA's fused path is strictly faster there.
    if batch < 1024 and not force_pallas:
        out = x @ w_t + bias2d
        return jnp.minimum(jnp.maximum(out, min_value), max_value)

    # Pad batch to a multiple of 8 (sublane) so every tile is (8,128)-legal;
    # padding rows are sliced off the output.
    padded_batch = max(8, _round_up(batch, 8))
    if padded_batch != batch:
        x = jnp.pad(x, ((0, padded_batch - batch), (0, 0)))

    # Tile sizing: cap 4096 rows (each padded f32 ref = TILE_M*128*4 B VMEM),
    # and prefer >= 2 grid steps so v7x's two TensorCores both get work.
    tile_cap = 4096
    if padded_batch > tile_cap:
        tile_m = tile_cap
    elif padded_batch >= 256:
        tile_m = _round_up(pl.cdiv(padded_batch, 2), 8)      # >= 2 grid steps
    else:
        tile_m = padded_batch
    grid_m = pl.cdiv(padded_batch, tile_m)

    kernel = functools.partial(
        _linear_clamp_kernel, min_value=min_value, max_value=max_value)

    cost = pl.CostEstimate(
        flops=2 * padded_batch * in_features * out_features,
        transcendentals=0,
        bytes_accessed=4 * (padded_batch * in_features
                            + in_features * out_features
                            + out_features
                            + padded_batch * out_features),
    )

    out = pl.pallas_call(
        kernel,
        out_shape=jax.ShapeDtypeStruct((padded_batch, out_features),
                                       jnp.float32),
        grid=(grid_m,),
        in_specs=[
            pl.BlockSpec((tile_m, in_features), lambda i: (i, 0)),        # x tile
            pl.BlockSpec((in_features, out_features), lambda i: (0, 0)),  # W^T (resident)
            pl.BlockSpec((1, out_features), lambda i: (0, 0)),            # bias (resident)
        ],
        out_specs=pl.BlockSpec((tile_m, out_features), lambda i: (i, 0)),
        compiler_params=pltpu.CompilerParams(
            dimension_semantics=("parallel",),
            vmem_limit_bytes=32 * 1024 * 1024),
        cost_estimate=cost,
    )(x, w_t, bias2d)

    if padded_batch != batch:
        out = out[:batch]
    return out


def _ref(x1, x2, weight, bias, min_value, max_value):
    v = jnp.concatenate([x1, x2], axis=1) @ weight.T + bias
    return jnp.minimum(jnp.maximum(v, min_value), max_value)


if __name__ == "__main__":
    key = jax.random.PRNGKey(0)
    k1, k2, k3, k4, kw, kb = jax.random.split(key, 6)

    in_features = 6     # from Linear(6, 8) in __init__
    out_features = 8
    min_value, max_value = 0.0, 0.5

    # Deterministic PyTorch-style init: U(-1/sqrt(in), 1/sqrt(in)).
    bound = 1.0 / (in_features ** 0.5)
    weight = jax.random.uniform(kw, (out_features, in_features),
                                minval=-bound, maxval=bound, dtype=jnp.float32)
    bias = jax.random.uniform(kb, (out_features,),
                              minval=-bound, maxval=bound, dtype=jnp.float32)

    # Case 1: small batch, Pallas path forced (single tile, exercises kernel).
    B1 = 8
    x1a = jax.random.normal(k1, (B1, in_features // 2), dtype=jnp.float32)
    x2a = jax.random.normal(k2, (B1, in_features // 2), dtype=jnp.float32)
    out_a = model_forward(x1a, x2a, weight, bias,
                          min_value=min_value, max_value=max_value,
                          force_pallas=True)
    jax.block_until_ready(out_a)
    ref_a = _ref(x1a, x2a, weight, bias, min_value, max_value)
    assert out_a.shape == (B1, out_features)
    assert jnp.allclose(out_a, ref_a, atol=1e-5, rtol=1e-5), "case1 mismatch"

    # Case 2: non-multiple-of-8 batch -> exercises padding + a 2-step grid
    # (the split that feeds v7x's two TensorCores).
    B2 = 600
    x1b = jax.random.normal(k3, (B2, in_features // 2), dtype=jnp.float32)
    x2b = jax.random.normal(k4, (B2, in_features // 2), dtype=jnp.float32)
    out_b = model_forward(x1b, x2b, weight, bias,
                          min_value=min_value, max_value=max_value,
                          force_pallas=True)
    jax.block_until_ready(out_b)
    ref_b = _ref(x1b, x2b, weight, bias, min_value, max_value)
    assert out_b.shape == (B2, out_features)
    assert jnp.allclose(out_b, ref_b, atol=1e-5, rtol=1e-5), "case2 mismatch"

    print("KERNEL_OK")
</pallas_src>

<mosaic_0001>
module attributes {stable_mosaic.version = 11 : i64} {
  func.func @_linear_clamp_kernel(%arg0: i32, %arg1: memref<8x6xf32, #tpu.memory_space<vmem>>, %arg2: memref<6x8xf32, #tpu.memory_space<vmem>>, %arg3: memref<1x8xf32, #tpu.memory_space<vmem>>, %arg4: memref<8x8xf32, #tpu.memory_space<vmem>>) attributes {dimension_semantics = [#tpu.dimension_semantics<parallel>], iteration_bounds = array<i64: 1>, scalar_prefetch = 0 : i64, scratch_operands = 0 : i64, tpu.core_type = #tpu.core_type<tc>, window_params = [{transform_indices = @transform_0, window_bounds = array<i64: 8, 6>}, {pipeline_mode = #tpu.pipeline_mode<synchronous>, transform_indices = @transform_1, window_bounds = array<i64: 6, 8>}, {pipeline_mode = #tpu.pipeline_mode<synchronous>, transform_indices = @transform_2, window_bounds = array<i64: 1, 8>}, {transform_indices = @transform_3, window_bounds = array<i64: 8, 8>}]} {
    %c0 = arith.constant 0 : index
    %c0_0 = arith.constant 0 : index
    %0 = vector.load %arg1[%c0, %c0_0] : memref<8x6xf32, #tpu.memory_space<vmem>>, vector<8x6xf32>
    %c0_1 = arith.constant 0 : index
    %c0_2 = arith.constant 0 : index
    %1 = vector.load %arg2[%c0_1, %c0_2] : memref<6x8xf32, #tpu.memory_space<vmem>>, vector<6x8xf32>
    %cst = arith.constant dense<0.000000e+00> : vector<8x8xf32>
    %2 = tpu.matmul %0, %1, %cst {dimension_numbers = #tpu.dot_dimension_numbers<[1], [0], [0], [1], [0, 0, 1, 1], [], []>} : vector<8x6xf32>, vector<6x8xf32>, vector<8x8xf32> -> vector<8x8xf32>
    %c0_3 = arith.constant 0 : index
    %c0_4 = arith.constant 0 : index
    %3 = vector.load %arg3[%c0_3, %c0_4] : memref<1x8xf32, #tpu.memory_space<vmem>>, vector<1x8xf32>
    %4 = vector.broadcast %3 : vector<1x8xf32> to vector<8x8xf32>
    %5 = arith.addf %2, %4 : vector<8x8xf32>
    %cst_5 = arith.constant 0.000000e+00 : f32
    %6 = vector.broadcast %cst_5 : f32 to vector<8x8xf32>
    %7 = arith.maximumf %5, %6 : vector<8x8xf32>
    %cst_6 = arith.constant 5.000000e-01 : f32
    %8 = vector.broadcast %cst_6 : f32 to vector<8x8xf32>
    %9 = arith.minimumf %7, %8 : vector<8x8xf32>
    %c0_7 = arith.constant 0 : index
    %c0_8 = arith.constant 0 : index
    %10 = vector.load %arg4[%c0_7, %c0_8] : memref<8x8xf32, #tpu.memory_space<vmem>>, vector<8x8xf32>
    tpu.vector_store %arg4[%c0_7, %c0_8], %9 {strides = array<i32>} : memref<8x8xf32, #tpu.memory_space<vmem>>, vector<8x8xf32>,
    return
  }
  func.func @transform_0(%arg0: i32) -> (i32, i32) {
    %c0_i32 = arith.constant 0 : i32
    %c0_i32_0 = arith.constant 0 : i32
    return %arg0, %c0_i32 : i32, i32
  }
  func.func @transform_1(%arg0: i32) -> (i32, i32) {
    %c0_i32 = arith.constant 0 : i32
    %c0_i32_0 = arith.constant 0 : i32
    %c0_i32_1 = arith.constant 0 : i32
    return %c0_i32, %c0_i32_0 : i32, i32
  }
  func.func @transform_2(%arg0: i32) -> (i32, i32) {
    %c0_i32 = arith.constant 0 : i32
    %c0_i32_0 = arith.constant 0 : i32
    %c0_i32_1 = arith.constant 0 : i32
    return %c0_i32, %c0_i32_0 : i32, i32
  }
  func.func @transform_3(%arg0: i32) -> (i32, i32) {
    %c0_i32 = arith.constant 0 : i32
    %c0_i32_0 = arith.constant 0 : i32
    return %arg0, %c0_i32 : i32, i32
  }
}

</mosaic_0001>

<bundles_post_ra>
// kernel: tpu_custom_call.1
= control target key start
LH: loop header
LB: loop body
LE: loop exit
PB: predicated region body
PF: predicated region fallthrough
CT: control target
= control target key end

     0   :  { %8 = vsyncpa [#allocation3], 0  ;;  %s264_s0 = inlined_call_operand.hbm [shape: f32[8,6], index: 0, kind: input, shape index: {}]   ;;  %s265_s1 = inlined_call_operand.hbm [shape: f32[6,8], index: 1, kind: input, shape index: {}]   ;;  %s266_s2 = inlined_call_operand.vmem [shape: f32[1,8], index: 2, kind: input, shape index: {}]   ;;  %s267_s3 = inlined_call_operand.hbm [shape: f32[8,8], index: 3, kind: output, shape index: {}]  }
   0x1   :  { %9 = vsyncpa [#allocation6], 0 }
   0x2   :  { %10 = vsyncpa [#allocation4], 0  ;;  %s227_s12 = smov [#allocation2]   ;;  %s228_s14 = smov [#allocation5]  }
   0x3   :  { %s17_s13 = sshll.u32 %s227_s12, 4  ;;  %s27_s15 = sshll.u32 %s228_s14, 4  ;;  %s18_s13 = int_to_ptr.vmem [resolvable:$true] %s17_s13  ;;  %s28_s15 = int_to_ptr.vmem [resolvable:$true] %s27_s15 }
   0x4   :  { %s169_s16 = scalar_lea.vmem %s18_s13, 128  ;;  %p174_p1 = scmp.lt.s32.totalorder %s18_s13, %s18_s13 }
   0x5   :  { %p170_p0 = scmp.ne.s32.totalorder %s18_s13, %s169_s16  ;;  %p175_p2 = scmp.lt.s32.totalorder %s169_s16, %s169_s16 }
   0x7   :  { %p176_p3 = por %p175_p2, %p174_p1 }
   0x9   :  { %p177_p4 = pnand %p176_p3, %p170_p0 }
   0xb   :  { %180 = shalt.err (!%p177_p4)
}
   0xc   :  { %20 = dma.hbm_to_vmem [thread:$0]  %s264_s0, 128, %s18_s13, [#allocation3]  }
   0xd   :  { %s189_s19 = scalar_lea.vmem %s28_s15, 128  ;;  %p194_p6 = scmp.lt.s32.totalorder %s28_s15, %s28_s15 }
   0xe   :  { %p190_p5 = scmp.ne.s32.totalorder %s28_s15, %s189_s19  ;;  %p195_p7 = scmp.lt.s32.totalorder %s189_s19, %s189_s19 }
  0x10   :  { %p196_p8 = por %p195_p7, %p194_p6 }
  0x12   :  { %p197_p9 = pnand %p196_p8, %p190_p5 }
  0x14   :  { %200 = shalt.err (!%p197_p9)
}
  0x15   :  { %30 = dma.hbm_to_vmem [thread:$0]  %s265_s1, 128, %s28_s15, [#allocation6]  }
  0x16   :  { %221 = dma.done.wait [#allocation3], 128  }
  0x17   :  { %222 = vsyncadd [#allocation3], 4294967168 }
  0x18   :  { %223 = dma.done.wait [#allocation6], 128  }
  0x19   :  { %224 = vsyncadd [#allocation6], 4294967168  ;;  %v229_v0 = vmov 0.0   ;;  %vm230_vm0 = vmmov 0   ;;  %vm52_vm1 = vcmask 1045504   ;;  %vm48_vm2 = vcmask 48128  }
  0x1a   :  { %151 = vmatprep.subr.mxu0 %v229_v0  ;;  %153 = vmatprep.mubr.msk.f32.mxu0 %vm230_vm0, %v229_v0  ;;  %v40_v1 = vld [vmem:[#allocation5] sm:$0x3f]  ;;  %v39_v2 = vld [vmem:[#allocation2] sm:$0xff]  ;;  %s231_s1 = smov [#allocation7]   ;;  %vm128_vm3 = vcmask 64512  }
  0x1b   :  { %152 = vmatpush3.msk.msra.mxu0 %vm52_vm1, %v40_v1  ;;  %v146_v3 = vld [vmem:[%s266_s2] ss:$0 sm:$0xff]  ;;  %s136_s23 = sshll.u32 %s231_s1, 4  ;;  %s137_s23 = int_to_ptr.vmem [resolvable:$true] %s136_s23 }
  0x1c   :  { %154 = vmatmul.mubr.msk.f32.vlgmr.msra.gmra.mxu0 %vm48_vm2, %v39_v2  ;;  %s201_s24 = scalar_lea.vmem %s137_s23, 128  ;;  %p206_p11 = scmp.lt.s32.totalorder %s137_s23, %s137_s23 }
  0x1d   :  { %p202_p10 = scmp.ne.s32.totalorder %s137_s23, %s201_s24  ;;  %p207_p12 = scmp.lt.s32.totalorder %s201_s24, %s201_s24 }
  0x1f   :  { %p208_p13 = por %p207_p12, %p206_p11 }
  0x21   :  { %p209_p0 = pnand %p208_p13, %p202_p10 }
  0xdc   :  { %v122_v4 = vpop.f32.mrf.mxu0 }
  0xdd   :  { %v123_v5 = vadd.f32 %v146_v3, %v122_v4 }
  0xde   :  { %v155_v6 = vpop.f32.mrf.mxu0 }
  0xdf   :  { %v126_v7 = vmax.f32 %v123_v5, 0.0 }
  0xe1   :  { %v127_v8 = vmin.f32 %v126_v7, 0.5 }
  0xe3   :  { %129 = vst.msk [vmem:[#allocation7] sm:$0xff] %vm128_vm3, %v127_v8 }
  0xe4   :  { %212 = shalt.err (!%p209_p0)
}
  0xe5   :  { %139 = dma.vmem_to_hbm [thread:$0]  %s137_s23, 128, %s267_s3, [#allocation4]  }
  0xe6   :  { %225 = dma.done.wait [#allocation4], 128  }
  0xe7   :  { %226 = vsyncadd [#allocation4], 4294967168 }
  0xe8   :  { %143 = vsyncpa [#allocation3], 1 }
  0xe9   :  { %144 = vsyncpa [#allocation6], 1 }
  0xea   :  { %145 = vsyncpa [#allocation4], 1 }

</bundles_post_ra>
